<compile_context>
chip_gen: v5e
topology: v5e:2x2
jax: 0.10.0
libtpu: 0.0.40
codegen_flags: <defaults>
</compile_context>

<pallas_src>
import jax
import jax.numpy as jnp
from jax.experimental import pallas as pl
from jax.experimental.pallas import tpu as pltpu


# ---------------------------------------------------------------------------
# Kernel
# ---------------------------------------------------------------------------
def _propagator_kernel(adj_ref, in_st_ref, out_st_ref, cur_ref,
                       wain_ref, waout_ref, wcrz_ref, wct_ref,
                       brz_ref, bt_ref, out_ref):
    bt_blk, n, d = cur_ref.shape          # (batch-block, n_node, state_dim)
    rows = bt_blk * n
    cdt = wain_ref.dtype                  # MXU operand dtype (bf16 by default)
    f32 = jnp.float32

    # ---- message passing: batched bmm on lane-dense, pre-split adjacency ----
    # adj_ref: (bt_blk, 2, n, ne); [:, 0] = A_in half, [:, 1] = A_out half.
    a_in = jnp.einsum("bnm,bmd->bnd", adj_ref[:, 0],
                      in_st_ref[...].astype(cdt),
                      preferred_element_type=f32).reshape(rows, d)
    a_out = jnp.einsum("bnm,bmd->bnd", adj_ref[:, 1],
                       out_st_ref[...].astype(cdt),
                       preferred_element_type=f32).reshape(rows, d)
    cur = cur_ref[...].astype(f32).reshape(rows, d)   # free sublane merge, n%8==0

    # ---- fused GRU-style gates: 4 wide bf16 matmuls, f32 accumulation -------
    # wain/waout: (d, 3d) = [Wr | Wz | Wt] rows acting on a_in / a_out.
    g_a = (jnp.dot(a_in.astype(cdt), wain_ref[...], preferred_element_type=f32)
           + jnp.dot(a_out.astype(cdt), waout_ref[...],
                     preferred_element_type=f32))                       # (rows, 3d)

    # reset / update gates together: sigmoid over a (rows, 2d) slab.
    rz = jax.nn.sigmoid(
        g_a[:, :2 * d]
        + jnp.dot(cur.astype(cdt), wcrz_ref[...], preferred_element_type=f32)
        + brz_ref[...])                                                 # (rows, 2d)
    r = rz[:, :d]
    z = rz[:, d:]

    # candidate state: tanh([a_in, a_out, r*cur] @ Wt + bt)
    h_hat = jnp.tanh(
        g_a[:, 2 * d:]
        + jnp.dot((r * cur).astype(cdt), wct_ref[...],
                  preferred_element_type=f32)
        + bt_ref[...])                                                  # (rows, d)

    out_rows = (1.0 - z) * cur + z * h_hat                              # (rows, d)

    # Single bulk store (sublane split is layout-free when n % 8 == 0).
    out_ref[...] = out_rows.reshape(bt_blk, n, d).astype(out_ref.dtype)


# ---------------------------------------------------------------------------
# Generation-aware configuration
# ---------------------------------------------------------------------------
def _tpu_config():
    """Returns (vmem_limit_bytes, target_rows, two_tensorcores)."""
    kind = ""
    try:
        kind = jax.devices()[0].device_kind.lower()
    except Exception:
        pass
    vmem_cap = None
    try:
        vmem_cap = int(pltpu.get_tpu_info().vmem_capacity_bytes)
    except Exception:
        vmem_cap = None
    if vmem_cap is None:
        vmem_cap = (64 << 20) if "7" in kind else (128 << 20)
    # Leave ~30% headroom for compiler scratch / double buffers:
    # ~45 MiB on v7x (64 MiB physical), ~90 MiB on v5e/v6e (128 MiB physical).
    vmem_limit = int(vmem_cap * 0.7)
    # v5e MXU is 4x128x128 -> M=128 already fills it; v6e/v7x are 256-wide.
    target_rows = 128 if "v5" in kind else 256
    two_cores = "7" in kind          # v7x: 2 TensorCores per chip
    return vmem_limit, target_rows, two_cores


def _pick_batch_block(bs, n_node, ne, d, *, vmem_limit, target_rows,
                      two_cores, act_itemsize):
    """Batch block that fills the MXU M dimension without blowing VMEM."""
    # Per-batch double-buffered DMA tiles:
    dma = 2 * (2 * n_node * ne * act_itemsize      # adjacency halves
               + 2 * ne * d * act_itemsize         # in/out states
               + n_node * d * 4                    # cur_state (f32)
               + n_node * d * 4)                   # output (f32)
    # In-kernel f32 temporaries (a_in/a_out, g_a(3d), rz(2d), h_hat, out, ...)
    # plus bf16 matmul-operand copies.
    tmp = n_node * d * (4 * 10 + act_itemsize * 4)
    per_batch = dma + tmp
    budget = int(vmem_limit * 0.6)
    cap = min(max(1, budget // max(per_batch, 1)),
              max(1, target_rows // max(n_node, 1)))
    bt = max(1, min(cap, bs))
    # v7x: keep the "parallel" grid axis >= 2 steps so both TensorCores work,
    # as long as each step still fills the MXU M dimension.
    if two_cores and bt >= bs and bt > 1 and (bt // 2) * n_node >= 128:
        bt = (bt + 1) // 2
    return bt


# ---------------------------------------------------------------------------
# One-time preparation (hoist out of the per-propagation-step path)
# ---------------------------------------------------------------------------
def pack_params(params, compute_dtype=jnp.bfloat16):
    """Repack the 3 Linear(3D, D) layers into 4 matmul operands (call once)."""
    d = params["wr"].shape[1]
    w_a = jnp.concatenate([params["wr"][:2 * d], params["wz"][:2 * d],
                           params["wt"][:2 * d]], axis=1)       # (2d, 3d)
    return {
        "w_a_in": w_a[:d].astype(compute_dtype),                 # (d, 3d)
        "w_a_out": w_a[d:].astype(compute_dtype),                # (d, 3d)
        "w_crz": jnp.concatenate([params["wr"][2 * d:], params["wz"][2 * d:]],
                                 axis=1).astype(compute_dtype),  # (d, 2d)
        "w_ct": params["wt"][2 * d:].astype(compute_dtype),      # (d, d)
        "b_rz": jnp.concatenate([params["br"], params["bz"]],
                                axis=1).astype(jnp.float32),     # (1, 2d)
        "b_t": params["bt"].astype(jnp.float32),                 # (1, d)
    }


def prepare_adjacency(adj_mat, compute_dtype=jnp.bfloat16):
    """(B, n, 2*ne) -> (B, 2, n, ne): lane-dense in/out halves.

    GGNN adjacency is 0/1 so bf16 is lossless.  For weighted (arbitrary-valued)
    adjacency pass compute_dtype=jnp.float32.  Call once per graph; it is
    reused across all propagation steps."""
    bs, n_node, two_ne = adj_mat.shape
    ne = two_ne // 2
    return (adj_mat.reshape(bs, n_node, 2, ne)
            .transpose(0, 2, 1, 3)
            .astype(compute_dtype))


def _pad_batch(x, pad_bs):
    bs = x.shape[0]
    if pad_bs == bs:
        return x
    return jnp.pad(x, ((0, pad_bs - bs),) + ((0, 0),) * (x.ndim - 1))


# ---------------------------------------------------------------------------
# Wrapper
# ---------------------------------------------------------------------------
def propagator_forward(in_states, out_states, cur_state, adj, params,
                       *, compute_dtype=jnp.bfloat16):
    """Pallas wrapper mirroring Propagator.forward.

    `adj` may be the raw (B, n, 2*ne) adjacency or the pre-split output of
    prepare_adjacency; `params` may be raw or pre-packed via pack_params.
    For best performance prepare/pack once outside the propagation loop."""
    bs, n_node, d = cur_state.shape
    ne = in_states.shape[1]                      # n_node * n_edge_type
    cdt = compute_dtype

    if adj.ndim == 3:                            # not yet prepared
        adj = prepare_adjacency(adj, cdt)
    assert adj.shape == (bs, 2, n_node, ne)
    packed = params if "w_a_in" in params else pack_params(params, cdt)

    # Per-step activations in the MXU operand dtype.
    # TODO(synk): in a full GGNN, have the per-edge-type Linear layers emit
    # bf16 directly so these casts fuse into the producers.
    in_s = in_states.astype(cdt)
    out_s = out_states.astype(cdt)
    cur_f32 = cur_state.astype(jnp.float32)

    vmem_limit, target_rows, two_cores = _tpu_config()
    bt_blk = _pick_batch_block(
        bs, n_node, ne, d, vmem_limit=vmem_limit, target_rows=target_rows,
        two_cores=two_cores, act_itemsize=jnp.dtype(cdt).itemsize)

    # Pad batch to a multiple of the block so odd batch sizes keep a full M.
    pad_bs = pl.cdiv(bs, bt_blk) * bt_blk
    adj_p = _pad_batch(adj, pad_bs)
    in_p = _pad_batch(in_s, pad_bs)
    out_p = _pad_batch(out_s, pad_bs)
    cur_p = _pad_batch(cur_f32, pad_bs)
    grid = (pad_bs // bt_blk,)

    # Advisory cost estimate: 2 bmm's + 9 fused DxD gate matmuls per node.
    flops = int(pad_bs * (4 * n_node * ne * d + 18 * n_node * d * d))
    bytes_accessed = int(
        adj_p.size * adj_p.dtype.itemsize
        + (in_p.size + out_p.size) * in_p.dtype.itemsize
        + 2 * cur_p.size * 4
        + sum(v.size * v.dtype.itemsize for v in packed.values()))
    cost = pl.CostEstimate(flops=flops,
                           transcendentals=int(3 * pad_bs * n_node * d),
                           bytes_accessed=bytes_accessed)

    out = pl.pallas_call(
        _propagator_kernel,
        out_shape=jax.ShapeDtypeStruct((pad_bs, n_node, d), cur_state.dtype),
        grid_spec=pltpu.PrefetchScalarGridSpec(
            num_scalar_prefetch=0,
            grid=grid,
            in_specs=[
                pl.BlockSpec((bt_blk, 2, n_node, ne), lambda b: (b, 0, 0, 0)),  # adj halves
                pl.BlockSpec((bt_blk, ne, d), lambda b: (b, 0, 0)),             # in_states
                pl.BlockSpec((bt_blk, ne, d), lambda b: (b, 0, 0)),             # out_states
                pl.BlockSpec((bt_blk, n_node, d), lambda b: (b, 0, 0)),         # cur_state
                pl.BlockSpec((d, 3 * d), lambda b: (0, 0)),                     # W_a (a_in rows)
                pl.BlockSpec((d, 3 * d), lambda b: (0, 0)),                     # W_a (a_out rows)
                pl.BlockSpec((d, 2 * d), lambda b: (0, 0)),                     # W_cur_rz
                pl.BlockSpec((d, d), lambda b: (0, 0)),                         # W_cur_t
                pl.BlockSpec((1, 2 * d), lambda b: (0, 0)),                     # bias rz
                pl.BlockSpec((1, d), lambda b: (0, 0)),                         # bias t
            ],
            out_specs=pl.BlockSpec((bt_blk, n_node, d), lambda b: (b, 0, 0)),
        ),
        compiler_params=pltpu.CompilerParams(
            dimension_semantics=("parallel",),
            vmem_limit_bytes=vmem_limit),
        cost_estimate=cost,
    )(adj_p, in_p, out_p, cur_p,
      packed["w_a_in"], packed["w_a_out"], packed["w_crz"], packed["w_ct"],
      packed["b_rz"], packed["b_t"])

    return out[:bs] if pad_bs != bs else out


# ---------------------------------------------------------------------------
# Pure-JAX reference (mirrors the PyTorch forward exactly when matmul_dtype
# is None; matmul_dtype=bf16 mirrors the kernel's mixed-precision numerics).
# ---------------------------------------------------------------------------
def propagator_reference(in_states, out_states, cur_state, adj_mat, params,
                         matmul_dtype=None):
    def q(x):
        if matmul_dtype is None:
            return x
        return x.astype(matmul_dtype).astype(jnp.float32)

    ne = in_states.shape[1]
    A_in = adj_mat[:, :, :ne]
    A_out = adj_mat[:, :, ne:]
    a_in = jnp.einsum("bnm,bmd->bnd", q(A_in), q(in_states))
    a_out = jnp.einsum("bnm,bmd->bnd", q(A_out), q(out_states))
    a = jnp.concatenate((a_in, a_out, cur_state), axis=2)
    r = jax.nn.sigmoid(q(a) @ q(params["wr"]) + params["br"])
    z = jax.nn.sigmoid(q(a) @ q(params["wz"]) + params["bz"])
    joint_h = jnp.concatenate((a_in, a_out, r * cur_state), axis=2)
    h_hat = jnp.tanh(q(joint_h) @ q(params["wt"]) + params["bt"])
    return (1.0 - z) * cur_state + z * h_hat


def init_params(key, state_dim):
    """Deterministic synthetic parameters (shapes match nn.Linear(3D, D)).

    Weights are stored already transposed as (3D, D) so both the kernel and the
    reference compute x @ W + b (equivalent to PyTorch's x @ W_torch.T + b)."""
    ks = jax.random.split(key, 6)
    bound = 1.0 / jnp.sqrt(3.0 * state_dim)
    shape_w = (3 * state_dim, state_dim)
    shape_b = (1, state_dim)
    u = lambda k, s: jax.random.uniform(k, s, jnp.float32, -bound, bound)
    return {
        "wr": u(ks[0], shape_w), "br": u(ks[1], shape_b),
        "wz": u(ks[2], shape_w), "bz": u(ks[3], shape_b),
        "wt": u(ks[4], shape_w), "bt": u(ks[5], shape_b),
    }


if __name__ == "__main__":
    key = jax.random.PRNGKey(0)
    configs = [
        dict(bs=2, n_node=8, n_edge_type=2, state_dim=32),
        # Exercises batch padding + multi-step grid.
        dict(bs=33, n_node=8, n_edge_type=2, state_dim=32),
    ]
    for cfg in configs:
        bs, n_node = cfg["bs"], cfg["n_node"]
        n_edge_type, state_dim = cfg["n_edge_type"], cfg["state_dim"]
        ne = n_node * n_edge_type

        key, k1, k2, k3, k4, k5 = jax.random.split(key, 6)
        in_states = jax.random.normal(k1, (bs, ne, state_dim), jnp.float32)
        out_states = jax.random.normal(k2, (bs, ne, state_dim), jnp.float32)
        cur_state = jax.random.normal(k3, (bs, n_node, state_dim), jnp.float32)
        adj_mat = (jax.random.uniform(k4, (bs, n_node, 2 * ne)) < 0.3).astype(
            jnp.float32)
        params = init_params(k5, state_dim)

        # One-time prep (amortized across GGNN propagation steps).
        packed = pack_params(params)
        adj_prep = prepare_adjacency(adj_mat)

        out = propagator_forward(in_states, out_states, cur_state, adj_prep,
                                 packed)
        out = jax.block_until_ready(out)
        assert out.shape == (bs, n_node, state_dim)

        # Mixed-precision-matched reference (same bf16 operand quantization).
        ref_mixed = propagator_reference(in_states, out_states, cur_state,
                                         adj_mat, params,
                                         matmul_dtype=jnp.bfloat16)
        assert jnp.allclose(out, ref_mixed, atol=2e-2, rtol=2e-2), (
            float(jnp.max(jnp.abs(out - ref_mixed))))

        # Strict f32 PyTorch-semantics reference (loose bound: bf16 operands).
        ref_f32 = propagator_reference(in_states, out_states, cur_state,
                                       adj_mat, params)
        assert float(jnp.max(jnp.abs(out - ref_f32))) < 0.1

    print("KERNEL_OK")
</pallas_src>

<mosaic_0001>
module attributes {stable_mosaic.version = 11 : i64} {
  func.func @_propagator_kernel(%arg0: i32, %arg1: memref<2x2x8x16xbf16, #tpu.memory_space<vmem>>, %arg2: memref<2x16x32xbf16, #tpu.memory_space<vmem>>, %arg3: memref<2x16x32xbf16, #tpu.memory_space<vmem>>, %arg4: memref<2x8x32xf32, #tpu.memory_space<vmem>>, %arg5: memref<32x96xbf16, #tpu.memory_space<vmem>>, %arg6: memref<32x96xbf16, #tpu.memory_space<vmem>>, %arg7: memref<32x64xbf16, #tpu.memory_space<vmem>>, %arg8: memref<32x32xbf16, #tpu.memory_space<vmem>>, %arg9: memref<1x64xf32, #tpu.memory_space<vmem>>, %arg10: memref<1x32xf32, #tpu.memory_space<vmem>>, %arg11: memref<2x8x32xf32, #tpu.memory_space<vmem>>) attributes {dimension_semantics = [#tpu.dimension_semantics<parallel>], iteration_bounds = array<i64: 1>, scalar_prefetch = 0 : i64, scratch_operands = 0 : i64, tpu.core_type = #tpu.core_type<tc>, window_params = [{transform_indices = @transform_0, window_bounds = array<i64: 2, 2, 8, 16>}, {transform_indices = @transform_1, window_bounds = array<i64: 2, 16, 32>}, {transform_indices = @transform_2, window_bounds = array<i64: 2, 16, 32>}, {transform_indices = @transform_3, window_bounds = array<i64: 2, 8, 32>}, {pipeline_mode = #tpu.pipeline_mode<synchronous>, transform_indices = @transform_4, window_bounds = array<i64: 32, 96>}, {pipeline_mode = #tpu.pipeline_mode<synchronous>, transform_indices = @transform_5, window_bounds = array<i64: 32, 96>}, {pipeline_mode = #tpu.pipeline_mode<synchronous>, transform_indices = @transform_6, window_bounds = array<i64: 32, 64>}, {pipeline_mode = #tpu.pipeline_mode<synchronous>, transform_indices = @transform_7, window_bounds = array<i64: 32, 32>}, {pipeline_mode = #tpu.pipeline_mode<synchronous>, transform_indices = @transform_8, window_bounds = array<i64: 1, 64>}, {pipeline_mode = #tpu.pipeline_mode<synchronous>, transform_indices = @transform_9, window_bounds = array<i64: 1, 32>}, {transform_indices = @transform_10, window_bounds = array<i64: 2, 8, 32>}]} {
    %c0 = arith.constant 0 : index
    %c0_0 = arith.constant 0 : index
    %c0_1 = arith.constant 0 : index
    %c0_2 = arith.constant 0 : index
    %0 = vector.load %arg1[%c0, %c0_0, %c0_1, %c0_2] : memref<2x2x8x16xbf16, #tpu.memory_space<vmem>>, vector<2x1x8x16xbf16>
    %1 = vector.shape_cast %0 : vector<2x1x8x16xbf16> to vector<2x8x16xbf16>
    %c0_3 = arith.constant 0 : index
    %c0_4 = arith.constant 0 : index
    %c0_5 = arith.constant 0 : index
    %2 = vector.load %arg2[%c0_3, %c0_4, %c0_5] : memref<2x16x32xbf16, #tpu.memory_space<vmem>>, vector<2x16x32xbf16>
    "tpu.trace_start"() <{level = 10 : i32, message = "bnm,bmd->bnd"}> : () -> ()
    %cst = arith.constant dense<0.000000e+00> : vector<2x8x32xf32>
    %3 = tpu.matmul %1, %2, %cst {dimension_numbers = #tpu.dot_dimension_numbers<[2], [1], [1], [2], [0, 0, 0, 1, 1, 2], [0], [0]>} : vector<2x8x16xbf16>, vector<2x16x32xbf16>, vector<2x8x32xf32> -> vector<2x8x32xf32>
    "tpu.trace_stop"() : () -> ()
    %4 = vector.shape_cast %3 : vector<2x8x32xf32> to vector<16x32xf32>
    %c0_6 = arith.constant 0 : index
    %c1 = arith.constant 1 : index
    %c0_7 = arith.constant 0 : index
    %c0_8 = arith.constant 0 : index
    %5 = vector.load %arg1[%c0_6, %c1, %c0_7, %c0_8] : memref<2x2x8x16xbf16, #tpu.memory_space<vmem>>, vector<2x1x8x16xbf16>
    %6 = vector.shape_cast %5 : vector<2x1x8x16xbf16> to vector<2x8x16xbf16>
    %c0_9 = arith.constant 0 : index
    %c0_10 = arith.constant 0 : index
    %c0_11 = arith.constant 0 : index
    %7 = vector.load %arg3[%c0_9, %c0_10, %c0_11] : memref<2x16x32xbf16, #tpu.memory_space<vmem>>, vector<2x16x32xbf16>
    "tpu.trace_start"() <{level = 10 : i32, message = "bnm,bmd->bnd"}> : () -> ()
    %cst_12 = arith.constant dense<0.000000e+00> : vector<2x8x32xf32>
    %8 = tpu.matmul %6, %7, %cst_12 {dimension_numbers = #tpu.dot_dimension_numbers<[2], [1], [1], [2], [0, 0, 0, 1, 1, 2], [0], [0]>} : vector<2x8x16xbf16>, vector<2x16x32xbf16>, vector<2x8x32xf32> -> vector<2x8x32xf32>
    "tpu.trace_stop"() : () -> ()
    %9 = vector.shape_cast %8 : vector<2x8x32xf32> to vector<16x32xf32>
    %c0_13 = arith.constant 0 : index
    %c0_14 = arith.constant 0 : index
    %c0_15 = arith.constant 0 : index
    %10 = vector.load %arg4[%c0_13, %c0_14, %c0_15] : memref<2x8x32xf32, #tpu.memory_space<vmem>>, vector<2x8x32xf32>
    %11 = vector.shape_cast %10 : vector<2x8x32xf32> to vector<16x32xf32>
    %12 = arith.truncf %4 : vector<16x32xf32> to vector<16x32xbf16>
    %c0_16 = arith.constant 0 : index
    %c0_17 = arith.constant 0 : index
    %13 = vector.load %arg5[%c0_16, %c0_17] : memref<32x96xbf16, #tpu.memory_space<vmem>>, vector<32x96xbf16>
    %cst_18 = arith.constant dense<0.000000e+00> : vector<16x96xf32>
    %14 = tpu.matmul %12, %13, %cst_18 {dimension_numbers = #tpu.dot_dimension_numbers<[1], [0], [0], [1], [0, 0, 1, 1], [], []>} : vector<16x32xbf16>, vector<32x96xbf16>, vector<16x96xf32> -> vector<16x96xf32>
    %15 = arith.truncf %9 : vector<16x32xf32> to vector<16x32xbf16>
    %c0_19 = arith.constant 0 : index
    %c0_20 = arith.constant 0 : index
    %16 = vector.load %arg6[%c0_19, %c0_20] : memref<32x96xbf16, #tpu.memory_space<vmem>>, vector<32x96xbf16>
    %cst_21 = arith.constant dense<0.000000e+00> : vector<16x96xf32>
    %17 = tpu.matmul %15, %16, %cst_21 {dimension_numbers = #tpu.dot_dimension_numbers<[1], [0], [0], [1], [0, 0, 1, 1], [], []>} : vector<16x32xbf16>, vector<32x96xbf16>, vector<16x96xf32> -> vector<16x96xf32>
    %18 = arith.addf %14, %17 : vector<16x96xf32>
    %19 = vector.extract_strided_slice %18 {offsets = [0, 0], sizes = [16, 64], strides = [1, 1]} : vector<16x96xf32> to vector<16x64xf32>
    %20 = arith.truncf %11 : vector<16x32xf32> to vector<16x32xbf16>
    %c0_22 = arith.constant 0 : index
    %c0_23 = arith.constant 0 : index
    %21 = vector.load %arg7[%c0_22, %c0_23] : memref<32x64xbf16, #tpu.memory_space<vmem>>, vector<32x64xbf16>
    %cst_24 = arith.constant dense<0.000000e+00> : vector<16x64xf32>
    %22 = tpu.matmul %20, %21, %cst_24 {dimension_numbers = #tpu.dot_dimension_numbers<[1], [0], [0], [1], [0, 0, 1, 1], [], []>} : vector<16x32xbf16>, vector<32x64xbf16>, vector<16x64xf32> -> vector<16x64xf32>
    %23 = arith.addf %19, %22 : vector<16x64xf32>
    %c0_25 = arith.constant 0 : index
    %c0_26 = arith.constant 0 : index
    %24 = vector.load %arg9[%c0_25, %c0_26] : memref<1x64xf32, #tpu.memory_space<vmem>>, vector<1x64xf32>
    %25 = vector.broadcast %24 : vector<1x64xf32> to vector<16x64xf32>
    %26 = arith.addf %23, %25 : vector<16x64xf32>
    %27 = arith.negf %26 : vector<16x64xf32>
    %28 = math.exp %27 : vector<16x64xf32>
    %cst_27 = arith.constant 1.000000e+00 : f32
    %29 = vector.broadcast %cst_27 : f32 to vector<16x64xf32>
    %30 = arith.addf %29, %28 : vector<16x64xf32>
    %31 = arith.divf %29, %30 : vector<16x64xf32>
    %32 = vector.extract_strided_slice %31 {offsets = [0, 0], sizes = [16, 32], strides = [1, 1]} : vector<16x64xf32> to vector<16x32xf32>
    %33 = vector.extract_strided_slice %31 {offsets = [0, 32], sizes = [16, 32], strides = [1, 1]} : vector<16x64xf32> to vector<16x32xf32>
    %34 = vector.extract_strided_slice %18 {offsets = [0, 64], sizes = [16, 32], strides = [1, 1]} : vector<16x96xf32> to vector<16x32xf32>
    %35 = arith.mulf %32, %11 : vector<16x32xf32>
    %36 = arith.truncf %35 : vector<16x32xf32> to vector<16x32xbf16>
    %c0_28 = arith.constant 0 : index
    %c0_29 = arith.constant 0 : index
    %37 = vector.load %arg8[%c0_28, %c0_29] : memref<32x32xbf16, #tpu.memory_space<vmem>>, vector<32x32xbf16>
    %cst_30 = arith.constant dense<0.000000e+00> : vector<16x32xf32>
    %38 = tpu.matmul %36, %37, %cst_30 {dimension_numbers = #tpu.dot_dimension_numbers<[1], [0], [0], [1], [0, 0, 1, 1], [], []>} : vector<16x32xbf16>, vector<32x32xbf16>, vector<16x32xf32> -> vector<16x32xf32>
    %39 = arith.addf %34, %38 : vector<16x32xf32>
    %c0_31 = arith.constant 0 : index
    %c0_32 = arith.constant 0 : index
    %40 = vector.load %arg10[%c0_31, %c0_32] : memref<1x32xf32, #tpu.memory_space<vmem>>, vector<1x32xf32>
    %41 = vector.broadcast %40 : vector<1x32xf32> to vector<16x32xf32>
    %42 = arith.addf %39, %41 : vector<16x32xf32>
    %43 = math.tanh %42 : vector<16x32xf32>
    %cst_33 = arith.constant 1.000000e+00 : f32
    %44 = vector.broadcast %cst_33 : f32 to vector<16x32xf32>
    %45 = arith.subf %44, %33 : vector<16x32xf32>
    %46 = arith.mulf %45, %11 : vector<16x32xf32>
    %47 = arith.mulf %33, %43 : vector<16x32xf32>
    %48 = arith.addf %46, %47 : vector<16x32xf32>
    %49 = vector.shape_cast %48 : vector<16x32xf32> to vector<2x8x32xf32>
    %c0_34 = arith.constant 0 : index
    %c0_35 = arith.constant 0 : index
    %c0_36 = arith.constant 0 : index
    %50 = vector.load %arg11[%c0_34, %c0_35, %c0_36] : memref<2x8x32xf32, #tpu.memory_space<vmem>>, vector<2x8x32xf32>
    tpu.vector_store %arg11[%c0_34, %c0_35, %c0_36], %49 {strides = array<i32>} : memref<2x8x32xf32, #tpu.memory_space<vmem>>, vector<2x8x32xf32>,
    return
  }
  func.func @transform_0(%arg0: i32) -> (i32, i32, i32, i32) {
    %c0_i32 = arith.constant 0 : i32
    %c0_i32_0 = arith.constant 0 : i32
    %c0_i32_1 = arith.constant 0 : i32
    %c0_i32_2 = arith.constant 0 : i32
    return %arg0, %c0_i32, %c0_i32_0, %c0_i32_1 : i32, i32, i32, i32
  }
  func.func @transform_1(%arg0: i32) -> (i32, i32, i32) {
    %c0_i32 = arith.constant 0 : i32
    %c0_i32_0 = arith.constant 0 : i32
    %c0_i32_1 = arith.constant 0 : i32
    return %arg0, %c0_i32, %c0_i32_0 : i32, i32, i32
  }
  func.func @transform_2(%arg0: i32) -> (i32, i32, i32) {
    %c0_i32 = arith.constant 0 : i32
    %c0_i32_0 = arith.constant 0 : i32
    %c0_i32_1 = arith.constant 0 : i32
    return %arg0, %c0_i32, %c0_i32_0 : i32, i32, i32
  }
  func.func @transform_3(%arg0: i32) -> (i32, i32, i32) {
    %c0_i32 = arith.constant 0 : i32
    %c0_i32_0 = arith.constant 0 : i32
    %c0_i32_1 = arith.constant 0 : i32
    return %arg0, %c0_i32, %c0_i32_0 : i32, i32, i32
  }
  func.func @transform_4(%arg0: i32) -> (i32, i32) {
    %c0_i32 = arith.constant 0 : i32
    %c0_i32_0 = arith.constant 0 : i32
    %c0_i32_1 = arith.constant 0 : i32
    return %c0_i32, %c0_i32_0 : i32, i32
  }
  func.func @transform_5(%arg0: i32) -> (i32, i32) {
    %c0_i32 = arith.constant 0 : i32
    %c0_i32_0 = arith.constant 0 : i32
    %c0_i32_1 = arith.constant 0 : i32
    return %c0_i32, %c0_i32_0 : i32, i32
  }
  func.func @transform_6(%arg0: i32) -> (i32, i32) {
    %c0_i32 = arith.constant 0 : i32
    %c0_i32_0 = arith.constant 0 : i32
    %c0_i32_1 = arith.constant 0 : i32
    return %c0_i32, %c0_i32_0 : i32, i32
  }
  func.func @transform_7(%arg0: i32) -> (i32, i32) {
    %c0_i32 = arith.constant 0 : i32
    %c0_i32_0 = arith.constant 0 : i32
    %c0_i32_1 = arith.constant 0 : i32
    return %c0_i32, %c0_i32_0 : i32, i32
  }
  func.func @transform_8(%arg0: i32) -> (i32, i32) {
    %c0_i32 = arith.constant 0 : i32
    %c0_i32_0 = arith.constant 0 : i32
    %c0_i32_1 = arith.constant 0 : i32
    return %c0_i32, %c0_i32_0 : i32, i32
  }
  func.func @transform_9(%arg0: i32) -> (i32, i32) {
    %c0_i32 = arith.constant 0 : i32
    %c0_i32_0 = arith.constant 0 : i32
    %c0_i32_1 = arith.constant 0 : i32
    return %c0_i32, %c0_i32_0 : i32, i32
  }
  func.func @transform_10(%arg0: i32) -> (i32, i32, i32) {
    %c0_i32 = arith.constant 0 : i32
    %c0_i32_0 = arith.constant 0 : i32
    %c0_i32_1 = arith.constant 0 : i32
    return %arg0, %c0_i32, %c0_i32_0 : i32, i32, i32
  }
}

</mosaic_0001>

<bundles_post_ra>
// kernel: tpu_custom_call.1
= control target key start
LH: loop header
LB: loop body
LE: loop exit
PB: predicated region body
PF: predicated region fallthrough
CT: control target
= control target key end

     0   :  { %15 = vsyncpa [#allocation3], 0  ;;  %s1004_s0 = inlined_call_operand.hbm [shape: bf16[2,2,8,16], index: 0, kind: input, shape index: {}]   ;;  %s1005_s1 = inlined_call_operand.hbm [shape: bf16[2,16,32], index: 1, kind: input, shape index: {}]   ;;  %s1006_s2 = inlined_call_operand.hbm [shape: bf16[2,16,32], index: 2, kind: input, shape index: {}]   ;;  %s1007_s3 = inlined_call_operand.hbm [shape: f32[2,8,32], index: 3, kind: input, shape index: {}]   ;;  %s1008_s4 = inlined_call_operand.hbm [shape: bf16[32,96], index: 4, kind: input, shape index: {}]   ;;  %s1009_s5 = inlined_call_operand.hbm [shape: bf16[32,96], index: 5, kind: input, shape index: {}]   ;;  %s1010_s6 = inlined_call_operand.hbm [shape: bf16[32,64], index: 6, kind: input, shape index: {}]   ;;  %s1011_s7 = inlined_call_operand.hbm [shape: bf16[32,32], index: 7, kind: input, shape index: {}]   ;;  %s1012_s8 = inlined_call_operand.vmem [shape: f32[1,64], index: 8, kind: input, shape index: {}]   ;;  %s1013_s9 = inlined_call_operand.vmem [shape: f32[1,32], index: 9, kind: input, shape index: {}]   ;;  %s1014_s10 = inlined_call_operand.hbm [shape: f32[2,8,32], index: 10, kind: output, shape index: {}]  }
   0x1   :  { %16 = vsyncpa [#allocation6], 0 }
   0x2   :  { %17 = vsyncpa [#allocation9], 0 }
   0x3   :  { %18 = vsyncpa [#allocation12], 0 }
   0x4   :  { %19 = vsyncpa [#allocation15], 0 }
   0x5   :  { %20 = vsyncpa [#allocation4], 0  ;;  %s38_s15 = sshll.u32 %s1005_s1, 4  ;;  %s855_s16 = smov [#allocation5]   ;;  %s39_s15 = int_to_ptr.hbm [resolvable:$true] %s38_s15 }
   0x6   :  { %s40_s17 = sshll.u32 %s855_s16, 4  ;;  %s64_s20 = sshll.u32 %s1007_s3, 4  ;;  %s41_s17 = int_to_ptr.vmem [resolvable:$true] %s40_s17  ;;  %s65_s20 = int_to_ptr.hbm [resolvable:$true] %s64_s20 }
   0x7   :  { %s856_s21 = smov 64   ;;  %s857_s22 = smov 4  }
   0x8   :  { %46 = dma.hbm_to_vmem [thread:$0]  %s39_s15, 256, %s41_s17, [#allocation6], %s856_s21, %s856_s21, %s857_s22  }
   0x9   :  { %s858_s23 = smov [#allocation8]   ;;  %s859_s25 = smov 128  }
   0xa   :  { %s66_s24 = sshll.u32 %s858_s23, 4  ;;  %s860_s1 = smov 8   ;;  %s67_s24 = int_to_ptr.vmem [resolvable:$true] %s66_s24 }
   0xb   :  { %72 = dma.hbm_to_vmem [thread:$0]  %s65_s20, 256, %s67_s24, [#allocation9], %s859_s25, %s859_s25, %s860_s1  }
   0xc   :  { %s90_s3 = sshll.u32 %s1009_s5, 4  ;;  %s861_s28 = smov [#allocation11]   ;;  %s91_s3 = int_to_ptr.hbm [resolvable:$true] %s90_s3 }
   0xd   :  { %s92_s29 = sshll.u32 %s861_s28, 4  ;;  %s25_s12 = sshll.u32 %s1004_s0, 4  ;;  %s93_s29 = int_to_ptr.vmem [resolvable:$true] %s92_s29  ;;  %s26_s12 = int_to_ptr.hbm [resolvable:$true] %s25_s12 }
   0xe   :  { %98 = dma.hbm_to_vmem [thread:$0]  %s91_s3, 256, %s93_s29, [#allocation12], %s856_s21, %s856_s21, %s857_s22  }
   0xf   :  { %s862_s13 = smov [#allocation2]   ;;  %s51_s17 = sshll.u32 %s1006_s2, 4  ;;  %s52_s17 = int_to_ptr.hbm [resolvable:$true] %s51_s17 }
  0x10   :  { %s27_s14 = sshll.u32 %s862_s13, 4  ;;  %s77_s0 = sshll.u32 %s1008_s4, 4  ;;  %s28_s14 = int_to_ptr.vmem [resolvable:$true] %s27_s14  ;;  %s78_s0 = int_to_ptr.hbm [resolvable:$true] %s77_s0 }
  0x11   :  { %33 = dma.hbm_to_vmem [thread:$0]  %s26_s12, 256, %s28_s14, [#allocation3], %s856_s21, %s856_s21, %s857_s22  }
  0x12   :  { %s863_s19 = smov [#allocation7]   ;;  %s864_s23 = smov [#allocation10]  }
  0x13   :  { %s53_s20 = sshll.u32 %s863_s19, 4  ;;  %s79_s2 = sshll.u32 %s864_s23, 4  ;;  %s54_s20 = int_to_ptr.vmem [resolvable:$true] %s53_s20  ;;  %s80_s2 = int_to_ptr.vmem [resolvable:$true] %s79_s2 }
  0x14   :  { %59 = dma.hbm_to_vmem [thread:$0]  %s52_s17, 256, %s54_s20, [#allocation6], %s856_s21, %s856_s21, %s857_s22  }
  0x15   :  { %s103_s27 = sshll.u32 %s1010_s6, 4  ;;  %s116_s28 = sshll.u32 %s1011_s7, 4  ;;  %s104_s27 = int_to_ptr.hbm [resolvable:$true] %s103_s27  ;;  %s117_s28 = int_to_ptr.hbm [resolvable:$true] %s116_s28 }
  0x16   :  { %85 = dma.hbm_to_vmem [thread:$0]  %s78_s0, 256, %s80_s2, [#allocation9], %s856_s21, %s856_s21, %s857_s22  }
  0x17   :  { %s865_s29 = smov [#allocation13]   ;;  %s866_s11 = smov [#allocation14]  }
  0x18   :  { %s105_s30 = sshll.u32 %s865_s29, 4  ;;  %s118_s6 = sshll.u32 %s866_s11, 4  ;;  %s106_s30 = int_to_ptr.vmem [resolvable:$true] %s105_s30  ;;  %s119_s6 = int_to_ptr.vmem [resolvable:$true] %s118_s6 }
  0x19   :  { %111 = dma.hbm_to_vmem [thread:$0]  %s104_s27, 256, %s106_s30, [#allocation12], %s856_s21, %s856_s21, %s857_s22  }
  0x1a   :  { %124 = dma.hbm_to_vmem [thread:$0]  %s117_s28, 256, %s119_s6, [#allocation15], %s856_s21, %s856_s21, %s857_s22  }
  0x1b   :  { %843 = dma.done.wait [#allocation3], 256  }
  0x1c   :  { %844 = vsyncadd [#allocation3], 4294967040 }
  0x1d   :  { %845 = dma.done.wait [#allocation6], 512  }
  0x1e   :  { %846 = vsyncadd [#allocation6], 4294966784 }
  0x1f   :  { %847 = dma.done.wait [#allocation9], 512  }
  0x20   :  { %848 = vsyncadd [#allocation9], 4294966784 }
  0x21   :  { %849 = dma.done.wait [#allocation12], 512  }
  0x22   :  { %850 = vsyncadd [#allocation12], 4294966784 }
  0x23   :  { %851 = dma.done.wait [#allocation15], 256  }
  0x24   :  { %852 = vsyncadd [#allocation15], 4294967040  ;;  %v586_v0 = vld [vmem:[#allocation5] sm:$0xff]  ;;  %v587_v1 = vld [vmem:[#allocation5 + $0x8] sm:$0xff]  ;;  %vm174_vm0 = vcmask 130048   ;;  %s867_s7 = smov 32  }
  0x25   :  { %v588_v2 = vld [vmem:[#allocation7] sm:$0xff]  ;;  %v589_v3 = vld [vmem:[#allocation7 + $0x8] sm:$0xff]  ;;  %185 = vmatpush.bf16.msra.mxu0 %v586_v0  ;;  %207 = vmatpush.bf16.msra.mxu1 %v587_v1  ;;  %v593_v9 = vld [vmem:[#allocation11 + $0x8] sm:$0xff]  ;;  %vm288_vm1 = vcmask 261120   ;;  %s511_s17 = sshll.u32 %s1014_s10, 4  ;;  %s512_s17 = int_to_ptr.hbm [resolvable:$true] %s511_s17 }
  0x26   :  { %v162_v4 = vld [vmem:[#allocation2] sm:$0xf]  ;;  %v163_v5 = vld [vmem:[#allocation2 + $0x8] sm:$0xf]  ;;  %v214_v6 = vld [vmem:[#allocation2 + $0x4] sm:$0xf]  ;;  %236 = vmatpush.bf16.msra.mxu2 %v588_v2  ;;  %258 = vmatpush.bf16.msra.mxu3 %v589_v3 }
  0x27   :  { %v595_v7 = vld [vmem:[#allocation13 + $0x8] sm:$0xff]  ;;  %v594_v11 = vld [vmem:[#allocation13] sm:$0xff]  ;;  %v973_v12 = vld [vmem:[#allocation8] sm:$0xff] }
  0x28   :  { %v215_v8 = vld [vmem:[#allocation2 + $0xc] sm:$0xf]  ;;  %532 = vmatmul.msk.bf16.vlgmr.msra.gmra.mxu0 %vm174_vm0, %v162_v4  ;;  %537 = vmatmul.msk.bf16.vlgmr.msra.gmra.mxu1 %vm174_vm0, %v163_v5  ;;  %v975_v13 = vld [vmem:[#allocation8 + $0x8] sm:$0xff]  ;;  %v590_v15 = vld [vmem:[#allocation10] sm:$0xff] }
  0x29   :  { %v591_v10 = vld [vmem:[#allocation10 + $0x8] sm:$0xff]  ;;  %542 = vmatmul.msk.bf16.vlgmr.msra.gmra.mxu2 %vm174_vm0, %v214_v6  ;;  %547 = vmatmul.msk.bf16.vlgmr.msra.gmra.mxu3 %vm174_vm0, %v215_v8  ;;  %v335_v14 = vpack.c.bf16 %v975_v13, %v973_v12  ;;  %v592_v16 = vld [vmem:[#allocation11] sm:$0xff]  ;;  %v613_v17 = vld [vmem:[%s1013_s9] ss:$0 sm:$0xff] }
  0x2a   :  { %361 = vmatpush.bf16.msrb.mxu2 %v595_v7  ;;  %298 = vmatpush.bf16.msrb.mxu0 %v593_v9  ;;  %v597_v28 = vld [vmem:[#allocation14 + $0x8] sm:$0xff]  ;;  %v614_v33 = vld [vmem:[%s1012_s8] ss:$0 sm:$0xff]  ;;  %v596_v36 = vld [vmem:[#allocation14] sm:$0xff]  ;;  %s868_s8 = smov 96  }
  0x2b   :  { %327 = vmatpush.bf16.msrb.mxu1 %v591_v10  ;;  %477 = vrot.lane.b32.xlu2 %v975_v13, %s867_s7 }
  0x2c   :  { %464 = vrot.lane.b32.xlu1 %v613_v17, %s856_s21  ;;  %443 = vmatpush.bf16.msrb.mxu3 %v597_v28 }
  0x2e   :  { %362 = vmatpush.bf16.msrb.mxu2 %v594_v11  ;;  %299 = vmatpush.bf16.msrb.mxu0 %v592_v16 }
  0x2f   :  { %328 = vmatpush.bf16.msrb.mxu1 %v590_v15 }
  0x30   :  { %444 = vmatpush.bf16.msrb.mxu3 %v596_v36 }
  0x34   :  { %475 = vrot.lane.b32.xlu1 %v973_v12, %s867_s7 }
  0x39   :  { %574 = vmatmul.msk.bf16.vlgmr.msrb.gmra.mxu2 %vm288_vm1, %v335_v14 }
  0x9e   :  { %v465_v14 = vpop.permute.xlu1 %464 }
  0xa5   :  { %v187_v18 = vpop.f32.mrf.mxu0  ;;  %v209_v19 = vpop.f32.mrf.mxu1 }
  0xa6   :  { %v266_v20 = vpack.c.bf16 %v209_v19, %v187_v18  ;;  %v478_v19 = vpop.permute.xlu2 %477 }
  0xa8   :  { %565 = vmatmul.msk.bf16.vlgmr.msrb.gmra.mxu1 %vm288_vm1, %v266_v20 }
  0xac   :  { %v238_v21 = vpop.f32.mrf.mxu2  ;;  %v260_v22 = vpop.f32.mrf.mxu3 }
  0xad   :  { %v271_v23 = vpack.c.bf16 %v260_v22, %v238_v21  ;;  %v189_v24 = vpop.f32.mrf.mxu0  ;;  %v211_v25 = vpop.f32.mrf.mxu1 }
  0xae   :  { %v476_v21 = vpop.permute.xlu1 %475 }
  0xaf   :  { %556 = vmatmul.msk.bf16.vlgmr.msrb.gmra.mxu0 %vm288_vm1, %v271_v23 }
  0xb4   :  { %v240_v26 = vpop.f32.mrf.mxu2  ;;  %v262_v27 = vpop.f32.mrf.mxu3 }
  0xbc   :  { %v364_v30 = vpop.f32.mrf.mxu2 }
  0xc4   :  { %v366_v41 = vpop.f32.mrf.mxu2 }
 0x125   :  { %v330_v29 = vpop.f32.mrf.mxu1 }
 0x12c   :  { %v301_v31 = vpop.f32.mrf.mxu0 }
 0x12d   :  { %v331_v32 = vadd.f32 %v330_v29, %v301_v31  ;;  %v332_v38 = vpop.f32.mrf.mxu1 }
 0x12f   :  { %v369_v34 = vadd.f32 %v364_v30, %v331_v32 }
 0x131   :  { %v375_v35 = vadd.f32 %v614_v33, %v369_v34 }
 0x133   :  { %v575_v37 = vmul.f32 -1.442695, %v375_v35 }
 0x134   :  { %v303_v39 = vpop.f32.mrf.mxu0 }
 0x135   :  { %615 = vpow2.f32 %v575_v37  ;;  %v333_v40 = vadd.f32 %v332_v38, %v303_v39 }
 0x137   :  { %v370_v42 = vadd.f32 %v366_v41, %v333_v40 }
 0x139   :  { %v376_v43 = vadd.f32 %v614_v33, %v370_v42 }
 0x13b   :  { %v616_v44 = vpop.eup %615  ;;  %v576_v45 = vmul.f32 -1.442695, %v376_v43 }
 0x13c   :  { %v383_v46 = vadd.f32 1.0, %v616_v44 }
 0x13d   :  { %617 = vpow2.f32 %v576_v45 }
 0x13e   :  { %619 = vrcp.f32 %v383_v46  ;;  %v396_v56 = vand.u32 2147483648, %v383_v46  ;;  %vm390_vm3 = vweird.f32 %v383_v46  ;;  %v394_v57 = vand.u32 2147483647, %v383_v46 }
 0x140   :  { %v397_v63 = vor.u32 1.1754944e-38, %v396_v56  ;;  %vm395_vm6 = vcmp.eq.f32.partialorder %v394_v57, 8.507059e+37 }
 0x143   :  { %v618_v47 = vpop.eup %617 }
 0x144   :  { %v620_v48 = vpop.eup %619  ;;  %v384_v49 = vadd.f32 1.0, %v618_v47 }
 0x145   :  { %v386_v50 = vmul.f32 %v620_v48, %v383_v46  ;;  %vm391_vm2 = vweird.f32 %v620_v48 }
 0x146   :  { %621 = vrcp.f32 %v384_v49  ;;  %vm392_vm4 = vmor %vm390_vm3, %vm391_vm2  ;;  %v411_v59 = vand.u32 2147483648, %v384_v49  ;;  %v409_v62 = vand.u32 2147483647, %v384_v49  ;;  %vm405_vm7 = vweird.f32 %v384_v49 }
 0x147   :  { %v387_v51 = vsub.f32 1.0, %v386_v50 }
 0x148   :  { %v412_v2 = vor.u32 1.1754944e-38, %v411_v59  ;;  %vm410_vm9 = vcmp.eq.f32.partialorder %v409_v62, 8.507059e+37 }
 0x149   :  { %v388_v52 = vmul.f32 %v620_v48, %v387_v51 }
 0x14b   :  { %v389_v54 = vadd.f32 %v620_v48, %v388_v52 }
 0x14c   :  { %v622_v53 = vpop.eup %621 }
 0x14d   :  { %v401_v55 = vmul.f32 %v622_v53, %v384_v49  ;;  %v393_v60 = vsel %vm392_vm4, %v620_v48, %v389_v54  ;;  %vm406_vm5 = vweird.f32 %v622_v53 }
 0x14e   :  { %v398_v1 = vsel %vm395_vm6, %v397_v63, %v393_v60  ;;  %vm407_vm8 = vmor %vm405_vm7, %vm406_vm5 }
 0x14f   :  { %v402_v58 = vsub.f32 1.0, %v401_v55  ;;  %v415_v5 = vmul.f32 %v398_v1, %v973_v12  ;;  %v471_v20 = vsub.f32 1.0, %v398_v1 }
 0x151   :  { %v403_v61 = vmul.f32 %v622_v53, %v402_v58  ;;  %v481_v23 = vmul.f32 %v476_v21, %v471_v20 }
 0x153   :  { %v404_v0 = vadd.f32 %v622_v53, %v403_v61 }
 0x155   :  { %v408_v3 = vsel %vm407_vm8, %v622_v53, %v404_v0 }
 0x156   :  { %v413_v4 = vsel %vm410_vm9, %v412_v2, %v408_v3 }
 0x157   :  { %v416_v6 = vmul.f32 %v413_v4, %v975_v13  ;;  %v472_v26 = vsub.f32 1.0, %v413_v4 }
 0x159   :  { %v417_v7 = vpack.c.bf16 %v416_v6, %v415_v5  ;;  %v482_v28 = vmul.f32 %v478_v19, %v472_v26 }
 0x15b   :  { %585 = vmatmul.msk.bf16.vlgmr.msrb.gmra.mxu3 %vm288_vm1, %v417_v7 }
 0x1de   :  { %v446_v8 = vpop.f32.mrf.mxu3 }
 0x1df   :  { %453 = vrot.lane.b32.xlu0 %v446_v8, %s856_s21 }
 0x1e6   :  { %v448_v9 = vpop.f32.mrf.mxu3 }
 0x1e7   :  { %455 = vrot.lane.b32.xlu0 %v448_v9, %s856_s21  ;;  %s869_s21 = smov [#allocation16]  }
 0x1e8   :  { %s509_s14 = sshll.u32 %s869_s21, 4  ;;  %s510_s14 = int_to_ptr.vmem [resolvable:$true] %s509_s14 }
 0x251   :  { %v454_v10 = vpop.permute.xlu0 %453 }
 0x252   :  { %v459_v11 = vadd.f32 %v454_v10, %v331_v32 }
 0x254   :  { %v467_v15 = vadd.f32 %v465_v14, %v459_v11 }
 0x256   :  { %623 = vtanh.f32 %v467_v15 }
 0x259   :  { %v456_v16 = vpop.permute.xlu0 %455 }
 0x25a   :  { %v460_v17 = vadd.f32 %v456_v16, %v333_v40 }
 0x25c   :  { %v624_v18 = vpop.eup %623  ;;  %v468_v12 = vadd.f32 %v465_v14, %v460_v17 }
 0x25d   :  { %485 = vrot.lane.b32.xlu2 %v624_v18, %s868_s8 }
 0x25e   :  { %625 = vtanh.f32 %v468_v12 }
 0x264   :  { %v626_v13 = vpop.eup %625 }
 0x265   :  { %487 = vrot.lane.b32.xlu0 %v626_v13, %s868_s8 }
 0x2b7   :  { %v486_v22 = vpop.permute.xlu2 %485 }
 0x2b8   :  { %v491_v24 = vmul.f32 %v486_v22, %v398_v1 }
 0x2ba   :  { %v493_v25 = vadd.f32 %v491_v24, %v481_v23 }
 0x2bc   :  { %497 = vrot.lane.b32.xlu1 %v493_v25, %s868_s8 }
 0x2d7   :  { %v488_v27 = vpop.permute.xlu0 %487 }
 0x2d8   :  { %v492_v29 = vmul.f32 %v488_v27, %v413_v4 }
 0x2da   :  { %v494_v30 = vadd.f32 %v492_v29, %v482_v28 }
 0x2dc   :  { %499 = vrot.lane.b32.xlu2 %v494_v30, %s868_s8 }
 0x32e   :  { %v498_v31 = vpop.permute.xlu1 %497 }
 0x32f   :  { %503 = vst.msk [vmem:[#allocation16] sm:$0xff] %vm288_vm1, %v498_v31 }
 0x336   :  { %v500_v32 = vpop.permute.xlu2 %499 }
 0x337   :  { %504 = vst.msk [vmem:[#allocation16 + $0x8] sm:$0xff] %vm288_vm1, %v500_v32 }
 0x338   :  { %517 = dma.vmem_to_hbm [thread:$0]  %s510_s14, 256, %s512_s17, [#allocation4], %s859_s25, %s859_s25, %s860_s1  }
 0x339   :  { %853 = dma.done.wait [#allocation4], 256  }
 0x33a   :  { %854 = vsyncadd [#allocation4], 4294967040 }
 0x33b   :  { %522 = vsyncpa [#allocation3], 1 }
 0x33c   :  { %523 = vsyncpa [#allocation6], 1 }
 0x33d   :  { %524 = vsyncpa [#allocation9], 1 }
 0x33e   :  { %525 = vsyncpa [#allocation12], 1 }
 0x33f   :  { %526 = vsyncpa [#allocation15], 1 }
 0x340   :  { %527 = vsyncpa [#allocation4], 1 }

</bundles_post_ra>
